<compile_context>
chip_gen: v6e
topology: v6e:2x2x1
jax: 0.10.0
libtpu: 0.0.40
codegen_flags: <defaults>
</compile_context>

<pallas_src>
import functools

import jax
import jax.numpy as jnp
from jax.experimental import pallas as pl
from jax.experimental.pallas import tpu as pltpu


def _round_up(x: int, m: int) -> int:
    return ((x + m - 1) // m) * m


def _sigmoid_f32(z):
    # sigmoid(z) == 0.5 * (1 + tanh(z / 2)): a single EUP transcendental,
    # keeps the epilogue off the VPU divide / exact-reciprocal path.
    return 0.5 * (jnp.tanh(0.5 * z) + 1.0)


def _linear_sigmoid_single_k_kernel(x_ref, w_ref, b_ref, o_ref):
    """K fits one tile: dot + bias + sigmoid straight to o_ref (no acc RMW)."""
    z = jnp.dot(x_ref[...], w_ref[...],
                preferred_element_type=jnp.float32) + b_ref[...]
    o_ref[...] = _sigmoid_f32(z).astype(o_ref.dtype)


def _linear_sigmoid_multi_k_kernel(x_ref, w_ref, b_ref, o_ref, acc_ref):
    """K tiled: f32 VMEM accumulator carried across the last grid axis."""
    k = pl.program_id(2)

    @pl.when(k == 0)
    def _():
        acc_ref[...] = jnp.zeros_like(acc_ref)

    acc_ref[...] += jnp.dot(x_ref[...], w_ref[...],
                            preferred_element_type=jnp.float32)

    @pl.when(k == pl.num_programs(2) - 1)
    def _():
        z = acc_ref[...] + b_ref[...]                  # [tm, tn] + [1, tn]
        o_ref[...] = _sigmoid_f32(z).astype(o_ref.dtype)


@functools.partial(jax.jit, static_argnames=("n_out", "tm", "tn", "tk"))
def _linear_net_forward(x, w_kn, b_row, *, n_out, tm, tn, tk):
    """x: [B, K] f32; w_kn: [Kp, Np] pre-padded bf16/f32; b_row: [1, Np] f32."""
    B, K = x.shape
    Kp, Np = w_kn.shape

    # Clamp the M tile to the (padded) batch; bf16 packs 2 rows per sublane.
    m_align = 16 if w_kn.dtype == jnp.bfloat16 else 8
    tm = max(m_align, min(tm, _round_up(B, m_align)))
    Mp = _round_up(B, tm)

    # Per-call prep touches only the activations (weights were padded/cast/
    # transposed once at init time).  Zero padding contributes 0 to the dot.
    xp = jnp.pad(x.astype(w_kn.dtype), ((0, Mp - B), (0, Kp - K)))

    gm, gn, gk = Mp // tm, Np // tn, Kp // tk
    bpe = 2 if w_kn.dtype == jnp.bfloat16 else 4
    cost = pl.CostEstimate(
        flops=2 * Mp * Np * Kp,
        transcendentals=Mp * Np,
        bytes_accessed=Mp * Kp * bpe + Kp * Np * bpe + Mp * Np * 4 + Np * 4,
    )
    # 48 MiB: safe on v7x (64 MiB/TC physical), ample headroom on v5e/v6e.
    # TODO(synk): per-generation retune (v6e could use ~96 MiB + wider tiles);
    # pipeline_mode=pl.Buffered(3) on x/w if a trace shows exposed DMA waits.
    vmem_limit = 48 * 1024 * 1024

    if gk == 1:
        # Common Linear case: whole K in one tile -> no accumulator pass.
        out_padded = pl.pallas_call(
            _linear_sigmoid_single_k_kernel,
            out_shape=jax.ShapeDtypeStruct((Mp, Np), x.dtype),
            grid_spec=pltpu.PrefetchScalarGridSpec(
                num_scalar_prefetch=0,
                grid=(gm, gn),
                in_specs=[
                    pl.BlockSpec((tm, tk), lambda i, j: (i, 0)),   # x
                    pl.BlockSpec((tk, tn), lambda i, j: (0, j)),   # W^T [in,out]
                    pl.BlockSpec((1, tn), lambda i, j: (0, j)),    # bias
                ],
                out_specs=pl.BlockSpec((tm, tn), lambda i, j: (i, j)),
            ),
            compiler_params=pltpu.CompilerParams(
                dimension_semantics=("parallel", "parallel"),
                vmem_limit_bytes=vmem_limit,
            ),
            cost_estimate=cost,
        )(xp, w_kn, b_row)
    else:
        out_padded = pl.pallas_call(
            _linear_sigmoid_multi_k_kernel,
            out_shape=jax.ShapeDtypeStruct((Mp, Np), x.dtype),
            grid_spec=pltpu.PrefetchScalarGridSpec(
                num_scalar_prefetch=0,
                grid=(gm, gn, gk),
                in_specs=[
                    pl.BlockSpec((tm, tk), lambda i, j, k: (i, k)),   # x
                    pl.BlockSpec((tk, tn), lambda i, j, k: (k, j)),   # W^T
                    pl.BlockSpec((1, tn), lambda i, j, k: (0, j)),    # bias
                ],
                out_specs=pl.BlockSpec((tm, tn), lambda i, j, k: (i, j)),
                scratch_shapes=[pltpu.VMEM((tm, tn), jnp.float32)],
            ),
            compiler_params=pltpu.CompilerParams(
                dimension_semantics=("parallel", "parallel", "arbitrary"),
                vmem_limit_bytes=vmem_limit,
            ),
            cost_estimate=cost,
        )(xp, w_kn, b_row)

    return out_padded[:B, :n_out]


class LinearNetPallas:
    """Pallas equivalent of the PyTorch LinearNet module.

    All weight prep (transpose to [in, out], zero-pad to tile-aligned shape,
    bf16 cast) happens ONCE here; the per-call forward only pads activations.
    """

    def __init__(self, weight, bias, *, tm=512, tn=512, tk=1024,
                 use_bf16_mxu=True):
        N, K = weight.shape          # PyTorch nn.Linear layout: [out, in]
        self.n_out = int(N)

        n128 = _round_up(N, 128)     # lane-dense output tiles
        k128 = _round_up(K, 128)
        tn = max(128, min(int(tn), n128))
        tk = max(128, min(int(tk), k128))
        # Megacore: if N would be a single tile but is wide enough, split it so
        # the "parallel" N grid axis can shard across v7x's two TensorCores.
        if _round_up(N, tn) == tn and n128 >= 256:
            tn = max(128, _round_up(n128 // 2, 128))
        Np = _round_up(N, tn)
        Kp = _round_up(K, tk)
        self.tm, self.tn, self.tk = int(tm), int(tn), int(tk)

        op_dtype = jnp.bfloat16 if use_bf16_mxu else jnp.float32
        # One-time: [out, in] -> [in, out] (kernel is a plain NN matmul, no
        # per-tile transpose), zero-pad to (Kp, Np), cast for the MXU.
        w_kn = jnp.pad(weight.astype(op_dtype).T, ((0, Kp - K), (0, Np - N)))
        b_row = jnp.pad(bias.astype(jnp.float32), (0, Np - N)).reshape(1, Np)
        self.w_kn = jax.block_until_ready(w_kn)
        self.b_row = jax.block_until_ready(b_row)

    def __call__(self, x):
        return _linear_net_forward(
            x, self.w_kn, self.b_row,
            n_out=self.n_out, tm=self.tm, tn=self.tn, tk=self.tk)


def init_linear_params(key, inp_dim, output_dim):
    # Deterministic init mimicking nn.Linear's U(-1/sqrt(in), 1/sqrt(in)),
    # kept in PyTorch layout [out_dim, inp_dim].
    kw, kb = jax.random.split(key)
    bound = 1.0 / (inp_dim ** 0.5)
    weight = jax.random.uniform(kw, (output_dim, inp_dim), jnp.float32,
                                minval=-bound, maxval=bound)
    bias = jax.random.uniform(kb, (output_dim,), jnp.float32,
                              minval=-bound, maxval=bound)
    return weight, bias


if __name__ == "__main__":
    key = jax.random.PRNGKey(0)
    k_x, k_p, k_x2, k_p2 = jax.random.split(key, 4)

    # --- small demo shape consistent with the module (single-K fast path) ---
    batch, inp_dim, output_dim = 8, 32, 16
    x = jax.random.normal(k_x, (batch, inp_dim), jnp.float32)
    weight, bias = init_linear_params(k_p, inp_dim, output_dim)

    ref = jax.nn.sigmoid(x @ weight.T + bias)

    model = LinearNetPallas(weight, bias)              # bf16 MXU by default
    out = jax.block_until_ready(model(x))
    assert out.shape == (batch, output_dim)
    assert jnp.allclose(out, ref, atol=2e-2), "bf16 path mismatch vs reference"

    model_f32 = LinearNetPallas(weight, bias, use_bf16_mxu=False)
    out_f32 = jax.block_until_ready(model_f32(x))
    assert jnp.allclose(out_f32, ref, atol=1e-5), "f32 path mismatch vs reference"

    # --- mid-size shape exercising the tiled multi-K accumulator path -------
    b2, k2, n2 = 64, 384, 256
    x2 = jax.random.normal(k_x2, (b2, k2), jnp.float32)
    w2, bias2 = init_linear_params(k_p2, k2, n2)
    model2 = LinearNetPallas(w2, bias2, tm=128, tn=128, tk=128)  # grid (1,2,3)
    out2 = jax.block_until_ready(model2(x2))
    ref2 = jax.nn.sigmoid(x2 @ w2.T + bias2)
    assert jnp.allclose(out2, ref2, atol=2e-2), "multi-K path mismatch vs reference"

    print("KERNEL_OK")
</pallas_src>

<mosaic_0001>
module attributes {stable_mosaic.version = 11 : i64} {
  func.func @_linear_sigmoid_single_k_kernel(%arg0: i32, %arg1: i32, %arg2: memref<16x128xbf16, #tpu.memory_space<vmem>>, %arg3: memref<128x128xbf16, #tpu.memory_space<vmem>>, %arg4: memref<1x128xf32, #tpu.memory_space<vmem>>, %arg5: memref<16x128xf32, #tpu.memory_space<vmem>>) attributes {dimension_semantics = [#tpu.dimension_semantics<parallel>, #tpu.dimension_semantics<parallel>], iteration_bounds = array<i64: 1, 1>, scalar_prefetch = 0 : i64, scratch_operands = 0 : i64, tpu.core_type = #tpu.core_type<tc>, window_params = [{transform_indices = @transform_0, window_bounds = array<i64: 16, 128>}, {transform_indices = @transform_1, window_bounds = array<i64: 128, 128>}, {transform_indices = @transform_2, window_bounds = array<i64: 1, 128>}, {transform_indices = @transform_3, window_bounds = array<i64: 16, 128>}]} {
    %c0 = arith.constant 0 : index
    %c0_0 = arith.constant 0 : index
    %0 = vector.load %arg2[%c0, %c0_0] : memref<16x128xbf16, #tpu.memory_space<vmem>>, vector<16x128xbf16>
    %c0_1 = arith.constant 0 : index
    %c0_2 = arith.constant 0 : index
    %1 = vector.load %arg3[%c0_1, %c0_2] : memref<128x128xbf16, #tpu.memory_space<vmem>>, vector<128x128xbf16>
    %cst = arith.constant dense<0.000000e+00> : vector<16x128xf32>
    %2 = tpu.matmul %0, %1, %cst {dimension_numbers = #tpu.dot_dimension_numbers<[1], [0], [0], [1], [0, 0, 1, 1], [], []>} : vector<16x128xbf16>, vector<128x128xbf16>, vector<16x128xf32> -> vector<16x128xf32>
    %c0_3 = arith.constant 0 : index
    %c0_4 = arith.constant 0 : index
    %3 = vector.load %arg4[%c0_3, %c0_4] : memref<1x128xf32, #tpu.memory_space<vmem>>, vector<1x128xf32>
    %4 = vector.broadcast %3 : vector<1x128xf32> to vector<16x128xf32>
    %5 = arith.addf %2, %4 : vector<16x128xf32>
    %cst_5 = arith.constant 5.000000e-01 : f32
    %6 = vector.broadcast %cst_5 : f32 to vector<16x128xf32>
    %7 = arith.mulf %6, %5 : vector<16x128xf32>
    %8 = math.tanh %7 : vector<16x128xf32>
    %cst_6 = arith.constant 1.000000e+00 : f32
    %9 = vector.broadcast %cst_6 : f32 to vector<16x128xf32>
    %10 = arith.addf %8, %9 : vector<16x128xf32>
    %cst_7 = arith.constant 5.000000e-01 : f32
    %11 = vector.broadcast %cst_7 : f32 to vector<16x128xf32>
    %12 = arith.mulf %11, %10 : vector<16x128xf32>
    %c0_8 = arith.constant 0 : index
    %c0_9 = arith.constant 0 : index
    %13 = vector.load %arg5[%c0_8, %c0_9] : memref<16x128xf32, #tpu.memory_space<vmem>>, vector<16x128xf32>
    tpu.vector_store %arg5[%c0_8, %c0_9], %12 {strides = array<i32>} : memref<16x128xf32, #tpu.memory_space<vmem>>, vector<16x128xf32>,
    return
  }
  func.func @transform_0(%arg0: i32, %arg1: i32) -> (i32, i32) {
    %c0_i32 = arith.constant 0 : i32
    %c0_i32_0 = arith.constant 0 : i32
    return %arg0, %c0_i32 : i32, i32
  }
  func.func @transform_1(%arg0: i32, %arg1: i32) -> (i32, i32) {
    %c0_i32 = arith.constant 0 : i32
    %c0_i32_0 = arith.constant 0 : i32
    return %c0_i32, %arg1 : i32, i32
  }
  func.func @transform_2(%arg0: i32, %arg1: i32) -> (i32, i32) {
    %c0_i32 = arith.constant 0 : i32
    %c0_i32_0 = arith.constant 0 : i32
    return %c0_i32, %arg1 : i32, i32
  }
  func.func @transform_3(%arg0: i32, %arg1: i32) -> (i32, i32) {
    %c0_i32 = arith.constant 0 : i32
    return %arg0, %arg1 : i32, i32
  }
}

</mosaic_0001>

<bundles_post_ra>
// kernel: _linear_net_forward.1
= control target key start
LH: loop header
LB: loop body
LE: loop exit
PB: predicated region body
PF: predicated region fallthrough
CT: control target
= control target key end

     0   :  { %8 = vsyncpa [#allocation3], 0  ;;  %s243_s12 = smov [#allocation2]   ;;  %s283_s0 = inlined_call_operand.vmem [shape: bf16[16,128], index: 0, kind: input, shape index: {}]   ;;  %s284_s1 = inlined_call_operand.hbm [shape: bf16[128,128], index: 1, kind: input, shape index: {}]   ;;  %s285_s2 = inlined_call_operand.vmem [shape: f32[1,128], index: 2, kind: input, shape index: {}]   ;;  %s286_s3 = inlined_call_operand.vmem [shape: f32[16,128], index: 3, kind: output, shape index: {}]  }
   0x1   :  { %s16_s13 = sshll.u32 %s243_s12, 4  ;;  %s17_s13 = int_to_ptr.vmem [resolvable:$true] %s16_s13 }
   0x2   :  { %s229_s14 = scalar_lea.vmem %s17_s13, 1024  ;;  %p234_p1 = scmp.lt.s32.totalorder %s17_s13, %s17_s13 }
   0x3   :  { %p230_p0 = scmp.ne.s32.totalorder %s17_s13, %s229_s14  ;;  %p235_p2 = scmp.lt.s32.totalorder %s229_s14, %s229_s14 }
   0x5   :  { %p236_p3 = por %p235_p2, %p234_p1 }
   0x7   :  { %p237_p4 = pnand %p236_p3, %p230_p0 }
   0x9   :  { %240 = shalt.err (!%p237_p4)
}
   0xa   :  { %s244_s15 = smov 64   ;;  %s245_s16 = smov 4  }
   0xb   :  { %22 = dma.hbm_to_vmem [thread:$0]  %s284_s1, 1024, %s17_s13, [#allocation3], %s244_s15, %s244_s15, %s245_s16  }
   0xc   :  { %241 = dma.done.wait [#allocation3], 1024  }
   0xd   :  { %242 = vsyncadd [#allocation3], 4294966272  ;;  %v246_v0 = vmov 0.0   ;;  %vm247_vm0 = vmmov 0   ;;  %v208_v1 = vld [vmem:[#allocation2 + $0x38] sm:$0xff]   ;;  %v209_v2 = vld [vmem:[#allocation2 + $0x30] sm:$0xff]  }
   0xe   :  { %183 = vmatprep.subr.bf16.mxu0 %v246_v0  ;;  %199 = vmatprep.mubr.msk.bf16.mxu0 %vm247_vm0, %v246_v0  ;;  %v210_v3 = vld [vmem:[#allocation2 + $0x28] sm:$0xff]   ;;  %v211_v4 = vld [vmem:[#allocation2 + $0x20] sm:$0xff]   ;;  %v212_v5 = vld [vmem:[#allocation2 + $0x18] sm:$0xff]  }
   0xf   :  { %184 = vmatpush3.bf16.msra.mxu0 %v208_v1  ;;  %v213_v6 = vld [vmem:[#allocation2 + $0x10] sm:$0xff]   ;;  %v214_v7 = vld [vmem:[#allocation2 + $0x8] sm:$0xff]   ;;  %v215_v8 = vld [vmem:[#allocation2] sm:$0xff]  }
  0x10   :  { %185 = vmatprep.subr.bf16.mxu0 %v246_v0  ;;  %v216_v9 = vld [vmem:[%s283_s0] sm:$0xff]  }
  0x11   :  { %v164_v10 = vld [vmem:[%s285_s2] ss:$0 sm:$0xff] }
  0x13   :  { %186 = vmatpush3.bf16.msra.mxu0 %v209_v2 }
  0x14   :  { %187 = vmatprep.subr.bf16.mxu0 %v246_v0 }
  0x17   :  { %188 = vmatpush3.bf16.msra.mxu0 %v210_v3 }
  0x18   :  { %189 = vmatprep.subr.bf16.mxu0 %v246_v0 }
  0x1b   :  { %190 = vmatpush3.bf16.msra.mxu0 %v211_v4 }
  0x1c   :  { %191 = vmatprep.subr.bf16.mxu0 %v246_v0 }
  0x1f   :  { %192 = vmatpush3.bf16.msra.mxu0 %v212_v5 }
  0x20   :  { %193 = vmatprep.subr.bf16.mxu0 %v246_v0 }
  0x23   :  { %194 = vmatpush3.bf16.msra.mxu0 %v213_v6 }
  0x24   :  { %195 = vmatprep.subr.bf16.mxu0 %v246_v0 }
  0x27   :  { %196 = vmatpush3.bf16.msra.mxu0 %v214_v7 }
  0x28   :  { %197 = vmatprep.subr.bf16.mxu0 %v246_v0 }
  0x2b   :  { %198 = vmatpush3.bf16.msra.mxu0 %v215_v8 }
  0x2e   :  { %200 = vmatmul.mubr.bf16.vlgmr.msra.gmra.mxu0 %v216_v9 }
  0xee   :  { %v142_v11 = vpop.f32.mrf.mxu0 }
  0xef   :  { %v143_v12 = vadd.f32 %v164_v10, %v142_v11 }
  0xf0   :  { %v201_v13 = vpop.f32.mrf.mxu0 }
  0xf1   :  { %v149_v14 = vmul.f32 0.5, %v143_v12 }
  0xf2   :  { %v145_v15 = vpop.f32.mrf.mxu0 }
  0xf3   :  { %217 = vtanh.f32 %v149_v14  ;;  %v146_v16 = vadd.f32 %v164_v10, %v145_v15 }
  0xf4   :  { %v202_v17 = vpop.f32.mrf.mxu0 }
  0xf5   :  { %v150_v18 = vmul.f32 0.5, %v146_v16 }
  0xf7   :  { %219 = vtanh.f32 %v150_v18 }
 0x100   :  { %v218_v19 = vpop.eup %217 }
 0x101   :  { %v153_v20 = vadd.f32 1.0, %v218_v19 }
 0x103   :  { %v155_v21 = vmul.f32 0.5, %v153_v20 }
 0x104   :  { %v220_v22 = vpop.eup %219 }
 0x105   :  { %157 = vst [vmem:[%s286_s3] sm:$0xff] %v155_v21  ;;  %v154_v23 = vadd.f32 1.0, %v220_v22 }
 0x107   :  { %v156_v24 = vmul.f32 0.5, %v154_v23 }
 0x109   :  { %158 = vst [vmem:[%s286_s3 + $0x8] sm:$0xff] %v156_v24 }
 0x10a   :  { %163 = vsyncpa [#allocation3], 1 }

</bundles_post_ra>
